<compile_context>
chip_gen: v5e
topology: v5e:2x2
jax: 0.10.0
libtpu: 0.0.40
codegen_flags: <defaults>
</compile_context>

<pallas_src>
import functools

import jax
import jax.numpy as jnp
from jax.experimental import pallas as pl
from jax.experimental.pallas import tpu as pltpu


def _pool_kernel(x_ref, o_ref, acc_ref, *, pool_type, inv_n, tn, n_true,
                 lane_width, lane_chunks, needs_mask):
    k = pl.program_id(1)
    nk = pl.num_programs(1)

    if pool_type == "max":
        init_val = -jnp.inf
        combine = jnp.maximum
    else:  # "avg" / "average"
        init_val = 0.0
        combine = jnp.add

    # Load tile; accumulate in f32 regardless of the input dtype.
    x = x_ref[...].astype(jnp.float32)                    # (TB, C, TN)

    if needs_mask:
        # Last N-tile may run past the true point count -> neutralize padded lanes.
        pos = jax.lax.broadcasted_iota(jnp.int32, x.shape, 2) + k * tn
        x = jnp.where(pos < n_true, x, init_val)

    @pl.when(k == 0)
    def _():
        acc_ref[...] = jnp.full(acc_ref.shape, init_val, dtype=acc_ref.dtype)

    # Elementwise (VPU) combine of lane chunks; defer the cross-lane (XLU) reduce
    # to the epilogue so the steady state is DMA + VPU only.
    partial = x[:, :, 0:lane_width]
    for j in range(1, lane_chunks):
        partial = combine(partial, x[:, :, j * lane_width:(j + 1) * lane_width])
    acc_ref[...] = combine(acc_ref[...], partial)

    @pl.when(k == nk - 1)
    def _():
        if pool_type == "max":
            red = jnp.max(acc_ref[...], axis=2)
        else:
            red = jnp.sum(acc_ref[...], axis=2) * jnp.float32(inv_n)
        o_ref[...] = red.astype(o_ref.dtype)


def pooling(x, pool_type="max", *, tb=None, tn=None):
    """Pallas equivalent of Pooling.forward: reduce (B, C, N) over axis 2 -> (B, C)."""
    if pool_type not in ("max", "avg", "average"):
        raise ValueError(f"unknown pool_type: {pool_type}")
    B, C, N = x.shape

    # ---- tile sizing -------------------------------------------------------
    TB = tb if tb is not None else min(8, B)          # sublane-full output rows
    dtype_bytes = jnp.dtype(x.dtype).itemsize
    if tn is None:
        # ~2 MiB input tile (double-buffered -> ~4 MiB in VMEM), TN multiple of 128.
        target_bytes = 2 * 1024 * 1024
        tn_fit = target_bytes // max(1, TB * C * dtype_bytes)
        TN = max(128, (tn_fit // 128) * 128)
        if N <= TN:
            TN = N            # single reduction step; block spans the full N axis
    else:
        TN = min(tn, N)

    grid_b = pl.cdiv(B, TB)
    grid_n = pl.cdiv(N, TN)
    needs_mask = (N % TN) != 0

    # Accumulator keeps up to 128 lanes so the per-step combine is purely elementwise.
    if TN >= 128 and TN % 128 == 0:
        lane_width, lane_chunks = 128, TN // 128
    else:
        lane_width, lane_chunks = TN, 1

    kernel = functools.partial(
        _pool_kernel,
        pool_type=pool_type,
        inv_n=1.0 / N,
        tn=TN,
        n_true=N,
        lane_width=lane_width,
        lane_chunks=lane_chunks,
        needs_mask=needs_mask,
    )

    return pl.pallas_call(
        kernel,
        out_shape=jax.ShapeDtypeStruct((B, C), x.dtype),
        grid_spec=pltpu.PrefetchScalarGridSpec(
            num_scalar_prefetch=0,
            grid=(grid_b, grid_n),
            in_specs=[pl.BlockSpec((TB, C, TN), lambda b, k: (b, 0, k))],
            out_specs=pl.BlockSpec((TB, C), lambda b, k: (b, 0)),
            scratch_shapes=[pltpu.VMEM((TB, C, lane_width), jnp.float32)],
        ),
        compiler_params=pltpu.CompilerParams(
            dimension_semantics=("parallel", "arbitrary"),
        ),
    )(x)


if __name__ == "__main__":
    key = jax.random.PRNGKey(0)

    # Small shape consistent with the module's forward: (batch, channels, points)
    B, C, N = 2, 4, 16
    x = jax.random.normal(key, (B, C, N), dtype=jnp.float32)

    out_max = pooling(x, pool_type="max")
    jax.block_until_ready(out_max)
    assert out_max.shape == (B, C)
    assert jnp.allclose(out_max, jnp.max(x, axis=2)), "max pooling mismatch"

    out_avg = pooling(x, pool_type="avg")
    jax.block_until_ready(out_avg)
    assert jnp.allclose(out_avg, jnp.mean(x, axis=2), atol=1e-6), "avg pooling mismatch"

    # Exercise the tiled path: N-reduction grid axis with a remainder tile and a
    # ragged batch block (B not a multiple of TB).
    key2 = jax.random.PRNGKey(1)
    B2, C2, N2 = 10, 16, 300
    x2 = jax.random.normal(key2, (B2, C2, N2), dtype=jnp.float32)
    out2_max = pooling(x2, pool_type="max", tb=8, tn=128)
    out2_avg = pooling(x2, pool_type="average", tb=8, tn=128)
    jax.block_until_ready((out2_max, out2_avg))
    assert jnp.allclose(out2_max, jnp.max(x2, axis=2)), "tiled max pooling mismatch"
    assert jnp.allclose(out2_avg, jnp.mean(x2, axis=2), atol=1e-5), "tiled avg pooling mismatch"

    print("KERNEL_OK")
</pallas_src>

<mosaic_0001>
module attributes {stable_mosaic.version = 11 : i64} {
  func.func @_pool_kernel(%arg0: i32, %arg1: i32, %arg2: memref<2x4x16xf32, #tpu.memory_space<vmem>>, %arg3: memref<2x4xf32, #tpu.memory_space<vmem>>, %arg4: memref<2x4x16xf32, #tpu.memory_space<vmem>>) attributes {dimension_semantics = [#tpu.dimension_semantics<parallel>, #tpu.dimension_semantics<arbitrary>], iteration_bounds = array<i64: 1, 1>, scalar_prefetch = 0 : i64, scratch_operands = 1 : i64, tpu.core_type = #tpu.core_type<tc>, window_params = [{transform_indices = @transform_0, window_bounds = array<i64: 2, 4, 16>}, {transform_indices = @transform_1, window_bounds = array<i64: 2, 4>}]} {
    %c0 = arith.constant 0 : index
    %c0_0 = arith.constant 0 : index
    %c0_1 = arith.constant 0 : index
    %0 = vector.load %arg2[%c0, %c0_0, %c0_1] : memref<2x4x16xf32, #tpu.memory_space<vmem>>, vector<2x4x16xf32>
    %c0_i32 = arith.constant 0 : i32
    %1 = arith.cmpi eq, %arg1, %c0_i32 : i32
    %2 = arith.extui %1 : i1 to i32
    %c0_i32_2 = arith.constant 0 : i32
    %3 = arith.cmpi ne, %2, %c0_i32_2 : i32
    scf.if %3 {
      %cst = arith.constant 0xFF800000 : f32
      %10 = vector.broadcast %cst : f32 to vector<2x4x16xf32>
      %c0_11 = arith.constant 0 : index
      %c0_12 = arith.constant 0 : index
      %c0_13 = arith.constant 0 : index
      %11 = vector.load %arg4[%c0_11, %c0_12, %c0_13] : memref<2x4x16xf32, #tpu.memory_space<vmem>>, vector<2x4x16xf32>
      tpu.vector_store %arg4[%c0_11, %c0_12, %c0_13], %10 {strides = array<i32>} : memref<2x4x16xf32, #tpu.memory_space<vmem>>, vector<2x4x16xf32>,
    } else {
    }
    %c0_3 = arith.constant 0 : index
    %c0_4 = arith.constant 0 : index
    %c0_5 = arith.constant 0 : index
    %4 = vector.load %arg4[%c0_3, %c0_4, %c0_5] : memref<2x4x16xf32, #tpu.memory_space<vmem>>, vector<2x4x16xf32>
    %5 = arith.maximumf %4, %0 : vector<2x4x16xf32>
    %c0_6 = arith.constant 0 : index
    %c0_7 = arith.constant 0 : index
    %c0_8 = arith.constant 0 : index
    %6 = vector.load %arg4[%c0_6, %c0_7, %c0_8] : memref<2x4x16xf32, #tpu.memory_space<vmem>>, vector<2x4x16xf32>
    tpu.vector_store %arg4[%c0_6, %c0_7, %c0_8], %5 {strides = array<i32>} : memref<2x4x16xf32, #tpu.memory_space<vmem>>, vector<2x4x16xf32>,
    %c0_i32_9 = arith.constant 0 : i32
    %7 = arith.cmpi eq, %arg1, %c0_i32_9 : i32
    %8 = arith.extui %7 : i1 to i32
    %c0_i32_10 = arith.constant 0 : i32
    %9 = arith.cmpi ne, %8, %c0_i32_10 : i32
    scf.if %9 {
      %c0_11 = arith.constant 0 : index
      %c0_12 = arith.constant 0 : index
      %c0_13 = arith.constant 0 : index
      %10 = vector.load %arg4[%c0_11, %c0_12, %c0_13] : memref<2x4x16xf32, #tpu.memory_space<vmem>>, vector<2x4x16xf32>
      %cst = arith.constant dense<0xFF800000> : vector<2x4xf32>
      %11 = vector.multi_reduction <maximumf>, %10, %cst [2] : vector<2x4x16xf32> to vector<2x4xf32>
      %c0_14 = arith.constant 0 : index
      %c0_15 = arith.constant 0 : index
      %12 = vector.load %arg3[%c0_14, %c0_15] : memref<2x4xf32, #tpu.memory_space<vmem>>, vector<2x4xf32>
      tpu.vector_store %arg3[%c0_14, %c0_15], %11 {strides = array<i32>} : memref<2x4xf32, #tpu.memory_space<vmem>>, vector<2x4xf32>,
    } else {
    }
    return
  }
  func.func @transform_0(%arg0: i32, %arg1: i32) -> (i32, i32, i32) {
    %c0_i32 = arith.constant 0 : i32
    %c0_i32_0 = arith.constant 0 : i32
    return %arg0, %c0_i32, %arg1 : i32, i32, i32
  }
  func.func @transform_1(%arg0: i32, %arg1: i32) -> (i32, i32) {
    %c0_i32 = arith.constant 0 : i32
    %c0_i32_0 = arith.constant 0 : i32
    return %arg0, %c0_i32 : i32, i32
  }
}

</mosaic_0001>

<bundles_post_ra>
// kernel: tpu_custom_call.1
= control target key start
LH: loop header
LB: loop body
LE: loop exit
PB: predicated region body
PF: predicated region fallthrough
CT: control target
= control target key end

     0   :  { %6 = vsyncpa [#allocation4], 0  ;;  %s164_s0 = inlined_call_operand.hbm [shape: f32[2,4,16], index: 0, kind: input, shape index: {}]   ;;  %s165_s1 = inlined_call_operand.hbm [shape: f32[2,4], index: 1, kind: output, shape index: {}]  }
   0x1   :  { %7 = vsyncpa [#allocation5], 0  ;;  %s12_s8 = sshll.u32 %s164_s0, 4  ;;  %s137_s9 = smov [#allocation3]   ;;  %s13_s8 = int_to_ptr.hbm [resolvable:$true] %s12_s8 }
   0x2   :  { %s14_s10 = sshll.u32 %s137_s9, 4  ;;  %s138_s11 = smov 64   ;;  %s15_s10 = int_to_ptr.vmem [resolvable:$true] %s14_s10 }
   0x3   :  { %s139_s12 = smov 4  }
   0x4   :  { %20 = dma.hbm_to_vmem [thread:$0]  %s13_s8, 128, %s15_s10, [#allocation4], %s138_s11, %s138_s11, %s139_s12  }
   0x5   :  { %133 = dma.done.wait [#allocation4], 128  }
   0x6   :  { %134 = vsyncadd [#allocation4], 4294967168  ;;  %vm31_vm0 = vcmask 125952   ;;  %v140_v0 = vmov -inf   ;;  %v25_v1 = vld [vmem:[#allocation3] sm:$0xf]  ;;  %v54_v12 = vlaneseq }
   0x7   :  { %32 = vst.msk [vmem:[#allocation2] sm:$0xf] %vm31_vm0, %v140_v0  ;;  %v26_v2 = vld [vmem:[#allocation3 + $0x4] sm:$0xf]  ;;  %s141_s0 = smov [#allocation6]   ;;  %s70_s16 = sshll.u32 %s165_s1, 4  ;;  %s71_s16 = int_to_ptr.hbm [resolvable:$true] %s70_s16 }
   0x8   :  { %33 = vst.msk [vmem:[#allocation2 + $0x4] sm:$0xf] %vm31_vm0, %v140_v0  ;;  %v55_v13 = vand.u32 127, %v54_v12  ;;  %s68_s13 = sshll.u32 %s141_s0, 4  ;;  %vm58_vm1 = vcmask 1041409   ;;  %vm61_vm2 = vcmask 25600   ;;  %s69_s13 = int_to_ptr.vmem [resolvable:$true] %s68_s13 }
   0xe   :  { %v34_v3 = vld [vmem:[#allocation2] sm:$0xf] }
   0xf   :  { %v35_v4 = vld [vmem:[#allocation2 + $0x4] sm:$0xf]  ;;  %v36_v5 = vmax.f32 %v34_v3, %v25_v1 }
  0x10   :  { %v37_v6 = vmax.f32 %v35_v4, %v26_v2 }
  0x11   :  { %39 = vst.msk [vmem:[#allocation2] sm:$0xf] %vm31_vm0, %v36_v5 }
  0x12   :  { %40 = vst.msk [vmem:[#allocation2 + $0x4] sm:$0xf] %vm31_vm0, %v37_v6 }
  0x18   :  { %v44_v7 = vld [vmem:[#allocation2] sm:$0xf] }
  0x19   :  { %v46_v8 = vsel %vm31_vm0, %v44_v7, -inf  ;;  %v45_v9 = vld [vmem:[#allocation2 + $0x4] sm:$0xf] }
  0x1a   :  { %47 = vmax.xlane.f32.xlu0 %v46_v8  ;;  %v49_v10 = vsel %vm31_vm0, %v45_v9, -inf }
  0x22   :  { %50 = vmax.xlane.f32.xlu0 %v49_v10 }
  0x8d   :  { %v48_v11 = vpop.xlane.xlu0 %47 }
  0x8e   :  { %v56_v15 = vperm.slane %v48_v11, %v55_v13 }
  0x95   :  { %v51_v14 = vpop.xlane.xlu0 %50 }
  0x96   :  { %v57_v16 = vperm.slane %v51_v14, %v55_v13 }
  0x98   :  { %v59_v17 = vsel %vm58_vm1, %v57_v16, %v56_v15 }
  0x99   :  { %62 = vst.msk [vmem:[#allocation6] sm:$0x3] %vm61_vm2, %v59_v17 }
  0x9a   :  { %73 = dma.vmem_to_hbm [thread:$0]  %s69_s13, 32, %s71_s16, [#allocation5]  }
  0x9b   :  { %135 = dma.done.wait [#allocation5], 32  }
  0x9c   :  { %136 = vsyncadd [#allocation5], 4294967264 }
  0x9d   :  { %78 = vsyncpa [#allocation4], 1 }
  0x9e   :  { %79 = vsyncpa [#allocation5], 1 }

</bundles_post_ra>
